<compile_context>
chip_gen: v5e
topology: v5e:2x2
jax: 0.10.0
libtpu: 0.0.40
codegen_flags: <defaults>
</compile_context>

<pallas_src>
import functools
import math

import jax
import jax.numpy as jnp
import numpy as np
from jax.experimental import pallas as pl
from jax.experimental.pallas import tpu as pltpu

ALPHA = 5.0   # self.alpha
EPS = 1e-6    # self.eps (PairwiseDistance eps and rc_out denominator eps)


def _rcl_kernel(tgt_ref, probs_ref, out_ref, *, W, radii):
    """One (b, z-block): rc_out + rc_in summed over TZ slices and both arteries."""
    zb = pl.program_id(1)

    @pl.when(zb == 0)
    def _():
        out_ref[...] = jnp.zeros_like(out_ref)

    # probs block: (2, TZ, HW); upcast in-kernel (input may be bf16).
    p0 = probs_ref[0].astype(jnp.float32)          # (TZ, HW) lumen
    p1 = probs_ref[1].astype(jnp.float32)          # (TZ, HW) outer wall
    TZ, HW = p0.shape

    # Recover (y, x) pixel coordinates from the lane-dense linear index.
    lin = jax.lax.broadcasted_iota(jnp.int32, (TZ, HW), 1)
    if W & (W - 1) == 0:                            # power-of-two W: shift/mask (VPU-cheap)
        shift = W.bit_length() - 1
        yy = jnp.right_shift(lin, shift).astype(jnp.float32)
        xx = jnp.bitwise_and(lin, W - 1).astype(jnp.float32)
    else:                                           # general W: integer div/mod
        yi = lin // W
        yy = yi.astype(jnp.float32)
        xx = (lin - yi * W).astype(jnp.float32)

    # Per-slice denominators (2 lane-reductions) and their exact reciprocals (per-slice,
    # so the divide cost is negligible; exact keeps us within the reference tolerance).
    sum_p0 = jnp.sum(p0, axis=-1, keepdims=True)    # (TZ, 1)
    sum_p1 = jnp.sum(p1, axis=-1, keepdims=True)
    inv0 = 1.0 / (sum_p0 + EPS)
    inv1 = 1.0 / (sum_p1 + EPS)

    # Per-artery distance maps and validity masks. Targets arrive as a (2, TZ, 2) VMEM
    # block: z on sublanes, (y, x) on lanes -> (TZ, 1) columns broadcast across lanes.
    d2 = []
    valid = []
    for a in range(2):
        ty = tgt_ref[a, :, 0:1]                     # (TZ, 1)
        tx = tgt_ref[a, :, 1:2]
        dy = yy - ty + EPS                          # torch PairwiseDistance adds eps to the diff
        dx = xx - tx + EPS
        d2.append(jnp.sqrt(dy * dy + dx * dx))      # (TZ, HW)
        valid.append((ty != -1.0).astype(jnp.float32))   # negpair check on coord 0

    # Single fused elementwise accumulator over both arteries and all four loss terms;
    # one final full reduction instead of 8 separate reduce trees.
    acc = jnp.zeros((TZ, HW), jnp.float32)
    for a in range(2):
        r0, r1 = radii[a]                           # lumen / outer-wall radii (python floats)
        inv_r0, inv_r1 = 1.0 / r0, 1.0 / r1
        k0 = 1.0 / (r0 * r0 * math.pi)
        k1 = 1.0 / (r1 * r1 * math.pi)
        # art mask (swapped in the reference): 1 strictly outside the OTHER artery's r_ow
        am = jnp.where(d2[1 - a] > radii[1 - a][1], jnp.float32(1.0), jnp.float32(0.0))
        m = valid[a]                                # (TZ, 1)

        e0 = jnp.exp(1.0 - d2[a] * inv_r0)
        e1 = jnp.exp(1.0 - d2[a] * inv_r1)

        w_out = am * (m * (1.0 / ALPHA))
        lu_dout = jnp.maximum(1.0 - e0, 0.0) * w_out
        ow_dout = jnp.maximum(1.0 - e1, 0.0) * w_out
        lu_din = jnp.maximum(e0 - 1.0, 0.0) * m
        ow_din = jnp.maximum(e1 - 1.0, 0.0) * m

        acc = (acc
               + (lu_dout * inv0) * p0
               + (ow_dout * inv1) * p1
               + (lu_din * k0) * (1.0 - p0)
               + (ow_din * k1) * (1.0 - p1))

    # Accumulate the block's contribution into the resident per-b output tile.
    out_ref[...] = out_ref[...] + jnp.sum(acc)


def _pick_tz(D, H, W, itemsize):
    """Largest divisor of D whose (2, TZ, H*W) probs block stays under ~4 MiB.

    TZ always divides D (no partial / out-of-bounds z blocks) and is either D itself or
    a multiple of 8 when possible (sublane-friendly second-to-last block dim).
    """
    budget = 4 << 20
    per_slice = 2 * H * W * itemsize
    max_tz = max(1, int(budget // per_slice))
    if D <= max_tz:
        return D
    divisors = [t for t in range(1, max_tz + 1) if D % t == 0]
    mult8 = [t for t in divisors if t % 8 == 0]
    return mult8[-1] if mult8 else divisors[-1]


def radius_constraint_loss(probs, targets, radiuses):
    """probs [B,2,D,H,W] (any float dtype); targets: two [B,D,2]; radiuses: (2,2) scalars."""
    probs = jnp.asarray(probs)                      # keep native dtype (bf16 stays bf16)
    B, C, D, H, W = probs.shape
    assert C == 2, "RadiusConstraintLoss expects 2 channels (lumen, outer wall)"
    HW = H * W

    # Free (contiguous) reshape to a lane-dense layout; no dtype conversion, no copies.
    probs2 = probs.reshape(B, C, D, HW)

    TZ = _pick_tz(D, H, W, probs.dtype.itemsize)
    NZ = D // TZ

    # Targets: (artery, B, D, (y, x)) so a (2, TZ, 2) VMEM block broadcasts per sublane.
    tgt = jnp.stack([jnp.asarray(t, jnp.float32) for t in targets], axis=0)   # (2, B, D, 2)

    radii = tuple((float(radiuses[a][0]), float(radiuses[a][1])) for a in range(2))
    kernel = functools.partial(_rcl_kernel, W=W, radii=radii)

    out = pl.pallas_call(
        kernel,
        out_shape=jax.ShapeDtypeStruct((B, 8, 128), jnp.float32),
        grid=(B, NZ),
        in_specs=[
            pl.BlockSpec((2, None, TZ, 2), lambda b, zb: (0, b, zb, 0)),      # targets
            pl.BlockSpec((None, C, TZ, HW), lambda b, zb: (b, 0, zb, 0)),     # probs
        ],
        # Same output block across the z axis -> VMEM-resident accumulator per b,
        # written back to HBM once per b (B * 4 KiB total).
        out_specs=pl.BlockSpec((None, 8, 128), lambda b, zb: (b, 0, 0)),
        compiler_params=pltpu.CompilerParams(
            dimension_semantics=("parallel", "arbitrary"),
            vmem_limit_bytes=32 * 1024 * 1024,
        ),
    )(tgt, probs2)

    # Per-b totals -> mean over all (b, z) slices (== sum_a(rc_out_a.mean() + rc_in_a.mean())).
    return jnp.sum(out[:, 0, 0]) / (B * D)


def _reference_loss(probs, targets, radiuses):
    """Pure-JAX transcription of the PyTorch RadiusConstraintLoss.forward (for validation)."""
    B, C, D, H, W = probs.shape
    yy, xx = jnp.meshgrid(jnp.arange(H, dtype=jnp.float32),
                          jnp.arange(W, dtype=jnp.float32), indexing="ij")
    grid = jnp.stack([yy, xx], axis=-1)                        # (H, W, 2)

    def d2_of(t):                                              # (B, D, 2) -> (B, 1, D, H, W)
        diff = grid[:, :, None, None, :] - t[None, None] + EPS
        d = jnp.sqrt(jnp.sum(diff * diff, axis=-1))            # (H, W, B, D)
        return jnp.transpose(d, (2, 3, 0, 1))[:, None]

    art_masks = []
    for t, r in zip(targets, radiuses):
        d2 = d2_of(t)
        dout = jax.nn.relu(jnp.exp(d2 / float(r[1]) - 1.0) - 1.0)
        art_masks.append(jnp.where(dout > 0, 1.0, dout))
    art_masks = [art_masks[1], art_masks[0]]

    p0, p1 = probs[:, :1], probs[:, 1:]
    loss = jnp.float32(0.0)
    for t, r, am in zip(targets, radiuses, art_masks):
        r0, r1 = float(r[0]), float(r[1])
        mask = (t[:, :, 0] != -1.0).astype(jnp.float32)[:, None, :, None, None]
        d2 = d2_of(t)
        lu_dout = jax.nn.relu(1.0 - jnp.exp(1.0 - d2 / r0)) / ALPHA * mask * am
        ow_dout = jax.nn.relu(1.0 - jnp.exp(1.0 - d2 / r1)) / ALPHA * mask * am
        lu_rc_out = (lu_dout * p0).sum(axis=(1, 3, 4)) / (p0.sum(axis=(1, 3, 4)) + EPS)
        ow_rc_out = (ow_dout * p1).sum(axis=(1, 3, 4)) / (p1.sum(axis=(1, 3, 4)) + EPS)
        rc_out = lu_rc_out + ow_rc_out
        lu_din = jax.nn.relu(jnp.exp(1.0 - d2 / r0) - 1.0) * mask
        ow_din = jax.nn.relu(jnp.exp(1.0 - d2 / r1) - 1.0) * mask
        lu_rc_in = (lu_din * (1.0 - p0)).sum(axis=(1, 3, 4)) / (r0 * r0 * math.pi)
        ow_rc_in = (ow_din * (1.0 - p1)).sum(axis=(1, 3, 4)) / (r1 * r1 * math.pi)
        rc_in = lu_rc_in + ow_rc_in
        loss = loss + rc_out.mean() + rc_in.mean()
    return loss


if __name__ == "__main__":
    key = jax.random.PRNGKey(0)
    B, C, D, H, W = 2, 2, 8, 16, 16
    k1, k2, k3 = jax.random.split(key, 3)

    probs = jax.nn.sigmoid(jax.random.normal(k1, (B, C, D, H, W), dtype=jnp.float32))
    t_i = jax.random.uniform(k2, (B, D, 2), minval=2.0, maxval=13.0, dtype=jnp.float32)
    t_e = jax.random.uniform(k3, (B, D, 2), minval=2.0, maxval=13.0, dtype=jnp.float32)
    t_i = t_i.at[0, 3].set(-1.0)            # "no centerline" slices exercise the negpair mask
    t_e = t_e.at[1, 5].set(-1.0)
    targets = [t_i, t_e]
    radiuses = np.array([[3.0, 6.0], [2.5, 5.5]], dtype=np.float32)  # [[r_lu, r_ow], ...]

    loss = jax.block_until_ready(radius_constraint_loss(probs, targets, radiuses))
    ref = jax.block_until_ready(_reference_loss(probs, targets, radiuses))
    assert jnp.allclose(loss, ref, rtol=2e-4, atol=1e-5), (loss, ref)
    print("KERNEL_OK")
</pallas_src>

<mosaic_0001>
module attributes {stable_mosaic.version = 11 : i64} {
  func.func @_rcl_kernel(%arg0: i32, %arg1: i32, %arg2: memref<2x1x8x2xf32, #tpu.memory_space<vmem>>, %arg3: memref<1x2x8x256xf32, #tpu.memory_space<vmem>>, %arg4: memref<1x8x128xf32, #tpu.memory_space<vmem>>) attributes {dimension_semantics = [#tpu.dimension_semantics<parallel>, #tpu.dimension_semantics<arbitrary>], iteration_bounds = array<i64: 2, 1>, scalar_prefetch = 0 : i64, scratch_operands = 0 : i64, tpu.core_type = #tpu.core_type<tc>, window_params = [{transform_indices = @transform_0, window_bounds = array<i64: 2, 1, 8, 2>}, {transform_indices = @transform_1, window_bounds = array<i64: 1, 2, 8, 256>}, {transform_indices = @transform_2, window_bounds = array<i64: 1, 8, 128>}]} {
    %c0_i32 = arith.constant 0 : i32
    %0 = arith.cmpi eq, %arg1, %c0_i32 : i32
    %1 = arith.extui %0 : i1 to i32
    %c0_i32_0 = arith.constant 0 : i32
    %2 = arith.cmpi ne, %1, %c0_i32_0 : i32
    scf.if %2 {
      %cst_82 = arith.constant 0.000000e+00 : f32
      %200 = vector.broadcast %cst_82 : f32 to vector<8x128xf32>
      %c0_83 = arith.constant 0 : index
      %c0_84 = arith.constant 0 : index
      %c0_85 = arith.constant 0 : index
      %201 = vector.load %arg4[%c0_83, %c0_84, %c0_85] : memref<1x8x128xf32, #tpu.memory_space<vmem>>, vector<1x8x128xf32>
      %202 = vector.shape_cast %201 : vector<1x8x128xf32> to vector<8x128xf32>
      %203 = vector.shape_cast %200 : vector<8x128xf32> to vector<1x8x128xf32>
      tpu.vector_store %arg4[%c0_83, %c0_84, %c0_85], %203 {strides = array<i32>} : memref<1x8x128xf32, #tpu.memory_space<vmem>>, vector<1x8x128xf32>,
    } else {
    }
    %c0 = arith.constant 0 : index
    %c0_1 = arith.constant 0 : index
    %c0_2 = arith.constant 0 : index
    %c0_3 = arith.constant 0 : index
    %3 = vector.load %arg3[%c0, %c0_1, %c0_2, %c0_3] : memref<1x2x8x256xf32, #tpu.memory_space<vmem>>, vector<1x1x8x256xf32>
    %4 = vector.shape_cast %3 : vector<1x1x8x256xf32> to vector<8x256xf32>
    %c0_4 = arith.constant 0 : index
    %c1 = arith.constant 1 : index
    %c0_5 = arith.constant 0 : index
    %c0_6 = arith.constant 0 : index
    %5 = vector.load %arg3[%c0_4, %c1, %c0_5, %c0_6] : memref<1x2x8x256xf32, #tpu.memory_space<vmem>>, vector<1x1x8x256xf32>
    %6 = vector.shape_cast %5 : vector<1x1x8x256xf32> to vector<8x256xf32>
    %7 = tpu.iota {dimensions = array<i32: 1>} : vector<8x256xi32>
    %c4_i32 = arith.constant 4 : i32
    %8 = vector.broadcast %c4_i32 : i32 to vector<8x256xi32>
    %9 = arith.shrsi %7, %8 : vector<8x256xi32>
    %10 = arith.sitofp %9 : vector<8x256xi32> to vector<8x256xf32>
    %c15_i32 = arith.constant 15 : i32
    %11 = vector.broadcast %c15_i32 : i32 to vector<8x256xi32>
    %12 = arith.andi %7, %11 : vector<8x256xi32>
    %13 = arith.sitofp %12 : vector<8x256xi32> to vector<8x256xf32>
    %cst = arith.constant dense<0.000000e+00> : vector<8xf32>
    %14 = vector.multi_reduction <add>, %4, %cst [1] : vector<8x256xf32> to vector<8xf32>
    %15 = vector.shape_cast %14 : vector<8xf32> to vector<8x1xf32>
    %cst_7 = arith.constant dense<0.000000e+00> : vector<8xf32>
    %16 = vector.multi_reduction <add>, %6, %cst_7 [1] : vector<8x256xf32> to vector<8xf32>
    %17 = vector.shape_cast %16 : vector<8xf32> to vector<8x1xf32>
    %cst_8 = arith.constant 9.99999997E-7 : f32
    %18 = vector.broadcast %cst_8 : f32 to vector<8x1xf32>
    %19 = arith.addf %15, %18 : vector<8x1xf32>
    %cst_9 = arith.constant 1.000000e+00 : f32
    %20 = vector.broadcast %cst_9 : f32 to vector<8x1xf32>
    %21 = arith.divf %20, %19 : vector<8x1xf32>
    %cst_10 = arith.constant 9.99999997E-7 : f32
    %22 = vector.broadcast %cst_10 : f32 to vector<8x1xf32>
    %23 = arith.addf %17, %22 : vector<8x1xf32>
    %cst_11 = arith.constant 1.000000e+00 : f32
    %24 = vector.broadcast %cst_11 : f32 to vector<8x1xf32>
    %25 = arith.divf %24, %23 : vector<8x1xf32>
    %c0_12 = arith.constant 0 : index
    %c0_13 = arith.constant 0 : index
    %c0_14 = arith.constant 0 : index
    %c0_15 = arith.constant 0 : index
    %26 = vector.load %arg2[%c0_12, %c0_13, %c0_14, %c0_15] : memref<2x1x8x2xf32, #tpu.memory_space<vmem>>, vector<1x1x8x1xf32>
    %27 = vector.shape_cast %26 : vector<1x1x8x1xf32> to vector<8x1xf32>
    %c0_16 = arith.constant 0 : index
    %c0_17 = arith.constant 0 : index
    %c0_18 = arith.constant 0 : index
    %c1_19 = arith.constant 1 : index
    %28 = vector.load %arg2[%c0_16, %c0_17, %c0_18, %c1_19] : memref<2x1x8x2xf32, #tpu.memory_space<vmem>>, vector<1x1x8x1xf32>
    %29 = vector.shape_cast %28 : vector<1x1x8x1xf32> to vector<8x1xf32>
    %30 = vector.broadcast %27 : vector<8x1xf32> to vector<8x256xf32>
    %31 = arith.subf %10, %30 : vector<8x256xf32>
    %cst_20 = arith.constant 9.99999997E-7 : f32
    %32 = vector.broadcast %cst_20 : f32 to vector<8x256xf32>
    %33 = arith.addf %31, %32 : vector<8x256xf32>
    %34 = vector.broadcast %29 : vector<8x1xf32> to vector<8x256xf32>
    %35 = arith.subf %13, %34 : vector<8x256xf32>
    %cst_21 = arith.constant 9.99999997E-7 : f32
    %36 = vector.broadcast %cst_21 : f32 to vector<8x256xf32>
    %37 = arith.addf %35, %36 : vector<8x256xf32>
    %38 = arith.mulf %33, %33 : vector<8x256xf32>
    %39 = arith.mulf %37, %37 : vector<8x256xf32>
    %40 = arith.addf %38, %39 : vector<8x256xf32>
    %41 = math.sqrt %40 : vector<8x256xf32>
    %cst_22 = arith.constant -1.000000e+00 : f32
    %42 = vector.broadcast %cst_22 : f32 to vector<8x1xf32>
    %43 = arith.cmpf one, %27, %42 : vector<8x1xf32>
    %44 = arith.extui %43 : vector<8x1xi1> to vector<8x1xi32>
    %45 = arith.sitofp %44 : vector<8x1xi32> to vector<8x1xf32>
    %c1_23 = arith.constant 1 : index
    %c0_24 = arith.constant 0 : index
    %c0_25 = arith.constant 0 : index
    %c0_26 = arith.constant 0 : index
    %46 = vector.load %arg2[%c1_23, %c0_24, %c0_25, %c0_26] : memref<2x1x8x2xf32, #tpu.memory_space<vmem>>, vector<1x1x8x1xf32>
    %47 = vector.shape_cast %46 : vector<1x1x8x1xf32> to vector<8x1xf32>
    %c1_27 = arith.constant 1 : index
    %c0_28 = arith.constant 0 : index
    %c0_29 = arith.constant 0 : index
    %c1_30 = arith.constant 1 : index
    %48 = vector.load %arg2[%c1_27, %c0_28, %c0_29, %c1_30] : memref<2x1x8x2xf32, #tpu.memory_space<vmem>>, vector<1x1x8x1xf32>
    %49 = vector.shape_cast %48 : vector<1x1x8x1xf32> to vector<8x1xf32>
    %50 = vector.broadcast %47 : vector<8x1xf32> to vector<8x256xf32>
    %51 = arith.subf %10, %50 : vector<8x256xf32>
    %cst_31 = arith.constant 9.99999997E-7 : f32
    %52 = vector.broadcast %cst_31 : f32 to vector<8x256xf32>
    %53 = arith.addf %51, %52 : vector<8x256xf32>
    %54 = vector.broadcast %49 : vector<8x1xf32> to vector<8x256xf32>
    %55 = arith.subf %13, %54 : vector<8x256xf32>
    %cst_32 = arith.constant 9.99999997E-7 : f32
    %56 = vector.broadcast %cst_32 : f32 to vector<8x256xf32>
    %57 = arith.addf %55, %56 : vector<8x256xf32>
    %58 = arith.mulf %53, %53 : vector<8x256xf32>
    %59 = arith.mulf %57, %57 : vector<8x256xf32>
    %60 = arith.addf %58, %59 : vector<8x256xf32>
    %61 = math.sqrt %60 : vector<8x256xf32>
    %cst_33 = arith.constant -1.000000e+00 : f32
    %62 = vector.broadcast %cst_33 : f32 to vector<8x1xf32>
    %63 = arith.cmpf one, %47, %62 : vector<8x1xf32>
    %64 = arith.extui %63 : vector<8x1xi1> to vector<8x1xi32>
    %65 = arith.sitofp %64 : vector<8x1xi32> to vector<8x1xf32>
    %cst_34 = arith.constant 0.000000e+00 : f32
    %66 = vector.broadcast %cst_34 : f32 to vector<8x256xf32>
    %cst_35 = arith.constant 5.500000e+00 : f32
    %67 = vector.broadcast %cst_35 : f32 to vector<8x256xf32>
    %68 = arith.cmpf ogt, %61, %67 : vector<8x256xf32>
    %cst_36 = arith.constant 1.000000e+00 : f32
    %cst_37 = arith.constant 0.000000e+00 : f32
    %69 = vector.broadcast %cst_36 : f32 to vector<8x256xf32>
    %70 = vector.broadcast %cst_37 : f32 to vector<8x256xf32>
    %71 = arith.select %68, %69, %70 : vector<8x256xi1>, vector<8x256xf32>
    %cst_38 = arith.constant 0.333333343 : f32
    %72 = vector.broadcast %cst_38 : f32 to vector<8x256xf32>
    %73 = arith.mulf %41, %72 : vector<8x256xf32>
    %cst_39 = arith.constant 1.000000e+00 : f32
    %74 = vector.broadcast %cst_39 : f32 to vector<8x256xf32>
    %75 = arith.subf %74, %73 : vector<8x256xf32>
    %76 = math.exp %75 : vector<8x256xf32>
    %cst_40 = arith.constant 0.166666672 : f32
    %77 = vector.broadcast %cst_40 : f32 to vector<8x256xf32>
    %78 = arith.mulf %41, %77 : vector<8x256xf32>
    %cst_41 = arith.constant 1.000000e+00 : f32
    %79 = vector.broadcast %cst_41 : f32 to vector<8x256xf32>
    %80 = arith.subf %79, %78 : vector<8x256xf32>
    %81 = math.exp %80 : vector<8x256xf32>
    %cst_42 = arith.constant 2.000000e-01 : f32
    %82 = vector.broadcast %cst_42 : f32 to vector<8x1xf32>
    %83 = arith.mulf %45, %82 : vector<8x1xf32>
    %84 = vector.broadcast %83 : vector<8x1xf32> to vector<8x256xf32>
    %85 = arith.mulf %71, %84 : vector<8x256xf32>
    %cst_43 = arith.constant 1.000000e+00 : f32
    %86 = vector.broadcast %cst_43 : f32 to vector<8x256xf32>
    %87 = arith.subf %86, %76 : vector<8x256xf32>
    %cst_44 = arith.constant 0.000000e+00 : f32
    %88 = vector.broadcast %cst_44 : f32 to vector<8x256xf32>
    %89 = arith.maximumf %87, %88 : vector<8x256xf32>
    %90 = arith.mulf %89, %85 : vector<8x256xf32>
    %cst_45 = arith.constant 1.000000e+00 : f32
    %91 = vector.broadcast %cst_45 : f32 to vector<8x256xf32>
    %92 = arith.subf %91, %81 : vector<8x256xf32>
    %cst_46 = arith.constant 0.000000e+00 : f32
    %93 = vector.broadcast %cst_46 : f32 to vector<8x256xf32>
    %94 = arith.maximumf %92, %93 : vector<8x256xf32>
    %95 = arith.mulf %94, %85 : vector<8x256xf32>
    %cst_47 = arith.constant 1.000000e+00 : f32
    %96 = vector.broadcast %cst_47 : f32 to vector<8x256xf32>
    %97 = arith.subf %76, %96 : vector<8x256xf32>
    %cst_48 = arith.constant 0.000000e+00 : f32
    %98 = vector.broadcast %cst_48 : f32 to vector<8x256xf32>
    %99 = arith.maximumf %97, %98 : vector<8x256xf32>
    %100 = vector.broadcast %45 : vector<8x1xf32> to vector<8x256xf32>
    %101 = arith.mulf %99, %100 : vector<8x256xf32>
    %cst_49 = arith.constant 1.000000e+00 : f32
    %102 = vector.broadcast %cst_49 : f32 to vector<8x256xf32>
    %103 = arith.subf %81, %102 : vector<8x256xf32>
    %cst_50 = arith.constant 0.000000e+00 : f32
    %104 = vector.broadcast %cst_50 : f32 to vector<8x256xf32>
    %105 = arith.maximumf %103, %104 : vector<8x256xf32>
    %106 = vector.broadcast %45 : vector<8x1xf32> to vector<8x256xf32>
    %107 = arith.mulf %105, %106 : vector<8x256xf32>
    %108 = vector.broadcast %21 : vector<8x1xf32> to vector<8x256xf32>
    %109 = arith.mulf %90, %108 : vector<8x256xf32>
    %110 = arith.mulf %109, %4 : vector<8x256xf32>
    %111 = arith.addf %66, %110 : vector<8x256xf32>
    %112 = vector.broadcast %25 : vector<8x1xf32> to vector<8x256xf32>
    %113 = arith.mulf %95, %112 : vector<8x256xf32>
    %114 = arith.mulf %113, %6 : vector<8x256xf32>
    %115 = arith.addf %111, %114 : vector<8x256xf32>
    %cst_51 = arith.constant 0.0353677645 : f32
    %116 = vector.broadcast %cst_51 : f32 to vector<8x256xf32>
    %117 = arith.mulf %101, %116 : vector<8x256xf32>
    %cst_52 = arith.constant 1.000000e+00 : f32
    %118 = vector.broadcast %cst_52 : f32 to vector<8x256xf32>
    %119 = arith.subf %118, %4 : vector<8x256xf32>
    %120 = arith.mulf %117, %119 : vector<8x256xf32>
    %121 = arith.addf %115, %120 : vector<8x256xf32>
    %cst_53 = arith.constant 0.00884194113 : f32
    %122 = vector.broadcast %cst_53 : f32 to vector<8x256xf32>
    %123 = arith.mulf %107, %122 : vector<8x256xf32>
    %cst_54 = arith.constant 1.000000e+00 : f32
    %124 = vector.broadcast %cst_54 : f32 to vector<8x256xf32>
    %125 = arith.subf %124, %6 : vector<8x256xf32>
    %126 = arith.mulf %123, %125 : vector<8x256xf32>
    %127 = arith.addf %121, %126 : vector<8x256xf32>
    %cst_55 = arith.constant 6.000000e+00 : f32
    %128 = vector.broadcast %cst_55 : f32 to vector<8x256xf32>
    %129 = arith.cmpf ogt, %41, %128 : vector<8x256xf32>
    %cst_56 = arith.constant 1.000000e+00 : f32
    %cst_57 = arith.constant 0.000000e+00 : f32
    %130 = vector.broadcast %cst_56 : f32 to vector<8x256xf32>
    %131 = vector.broadcast %cst_57 : f32 to vector<8x256xf32>
    %132 = arith.select %129, %130, %131 : vector<8x256xi1>, vector<8x256xf32>
    %cst_58 = arith.constant 4.000000e-01 : f32
    %133 = vector.broadcast %cst_58 : f32 to vector<8x256xf32>
    %134 = arith.mulf %61, %133 : vector<8x256xf32>
    %cst_59 = arith.constant 1.000000e+00 : f32
    %135 = vector.broadcast %cst_59 : f32 to vector<8x256xf32>
    %136 = arith.subf %135, %134 : vector<8x256xf32>
    %137 = math.exp %136 : vector<8x256xf32>
    %cst_60 = arith.constant 0.181818187 : f32
    %138 = vector.broadcast %cst_60 : f32 to vector<8x256xf32>
    %139 = arith.mulf %61, %138 : vector<8x256xf32>
    %cst_61 = arith.constant 1.000000e+00 : f32
    %140 = vector.broadcast %cst_61 : f32 to vector<8x256xf32>
    %141 = arith.subf %140, %139 : vector<8x256xf32>
    %142 = math.exp %141 : vector<8x256xf32>
    %cst_62 = arith.constant 2.000000e-01 : f32
    %143 = vector.broadcast %cst_62 : f32 to vector<8x1xf32>
    %144 = arith.mulf %65, %143 : vector<8x1xf32>
    %145 = vector.broadcast %144 : vector<8x1xf32> to vector<8x256xf32>
    %146 = arith.mulf %132, %145 : vector<8x256xf32>
    %cst_63 = arith.constant 1.000000e+00 : f32
    %147 = vector.broadcast %cst_63 : f32 to vector<8x256xf32>
    %148 = arith.subf %147, %137 : vector<8x256xf32>
    %cst_64 = arith.constant 0.000000e+00 : f32
    %149 = vector.broadcast %cst_64 : f32 to vector<8x256xf32>
    %150 = arith.maximumf %148, %149 : vector<8x256xf32>
    %151 = arith.mulf %150, %146 : vector<8x256xf32>
    %cst_65 = arith.constant 1.000000e+00 : f32
    %152 = vector.broadcast %cst_65 : f32 to vector<8x256xf32>
    %153 = arith.subf %152, %142 : vector<8x256xf32>
    %cst_66 = arith.constant 0.000000e+00 : f32
    %154 = vector.broadcast %cst_66 : f32 to vector<8x256xf32>
    %155 = arith.maximumf %153, %154 : vector<8x256xf32>
    %156 = arith.mulf %155, %146 : vector<8x256xf32>
    %cst_67 = arith.constant 1.000000e+00 : f32
    %157 = vector.broadcast %cst_67 : f32 to vector<8x256xf32>
    %158 = arith.subf %137, %157 : vector<8x256xf32>
    %cst_68 = arith.constant 0.000000e+00 : f32
    %159 = vector.broadcast %cst_68 : f32 to vector<8x256xf32>
    %160 = arith.maximumf %158, %159 : vector<8x256xf32>
    %161 = vector.broadcast %65 : vector<8x1xf32> to vector<8x256xf32>
    %162 = arith.mulf %160, %161 : vector<8x256xf32>
    %cst_69 = arith.constant 1.000000e+00 : f32
    %163 = vector.broadcast %cst_69 : f32 to vector<8x256xf32>
    %164 = arith.subf %142, %163 : vector<8x256xf32>
    %cst_70 = arith.constant 0.000000e+00 : f32
    %165 = vector.broadcast %cst_70 : f32 to vector<8x256xf32>
    %166 = arith.maximumf %164, %165 : vector<8x256xf32>
    %167 = vector.broadcast %65 : vector<8x1xf32> to vector<8x256xf32>
    %168 = arith.mulf %166, %167 : vector<8x256xf32>
    %169 = vector.broadcast %21 : vector<8x1xf32> to vector<8x256xf32>
    %170 = arith.mulf %151, %169 : vector<8x256xf32>
    %171 = arith.mulf %170, %4 : vector<8x256xf32>
    %172 = arith.addf %127, %171 : vector<8x256xf32>
    %173 = vector.broadcast %25 : vector<8x1xf32> to vector<8x256xf32>
    %174 = arith.mulf %156, %173 : vector<8x256xf32>
    %175 = arith.mulf %174, %6 : vector<8x256xf32>
    %176 = arith.addf %172, %175 : vector<8x256xf32>
    %cst_71 = arith.constant 0.0509295836 : f32
    %177 = vector.broadcast %cst_71 : f32 to vector<8x256xf32>
    %178 = arith.mulf %162, %177 : vector<8x256xf32>
    %cst_72 = arith.constant 1.000000e+00 : f32
    %179 = vector.broadcast %cst_72 : f32 to vector<8x256xf32>
    %180 = arith.subf %179, %4 : vector<8x256xf32>
    %181 = arith.mulf %178, %180 : vector<8x256xf32>
    %182 = arith.addf %176, %181 : vector<8x256xf32>
    %cst_73 = arith.constant 0.0105226412 : f32
    %183 = vector.broadcast %cst_73 : f32 to vector<8x256xf32>
    %184 = arith.mulf %168, %183 : vector<8x256xf32>
    %cst_74 = arith.constant 1.000000e+00 : f32
    %185 = vector.broadcast %cst_74 : f32 to vector<8x256xf32>
    %186 = arith.subf %185, %6 : vector<8x256xf32>
    %187 = arith.mulf %184, %186 : vector<8x256xf32>
    %188 = arith.addf %182, %187 : vector<8x256xf32>
    %c0_75 = arith.constant 0 : index
    %c0_76 = arith.constant 0 : index
    %c0_77 = arith.constant 0 : index
    %189 = vector.load %arg4[%c0_75, %c0_76, %c0_77] : memref<1x8x128xf32, #tpu.memory_space<vmem>>, vector<1x8x128xf32>
    %190 = vector.shape_cast %189 : vector<1x8x128xf32> to vector<8x128xf32>
    %191 = vector.shape_cast %188 : vector<8x256xf32> to vector<1x8x256xf32>
    %cst_78 = arith.constant dense<0.000000e+00> : vector<1xf32>
    %192 = vector.multi_reduction <add>, %191, %cst_78 [1, 2] : vector<1x8x256xf32> to vector<1xf32>
    %193 = vector.shape_cast %192 : vector<1xf32> to vector<1x1x1xf32>
    %194 = vector.extract %193[0, 0, 0] : f32 from vector<1x1x1xf32>
    %195 = vector.broadcast %194 : f32 to vector<8x128xf32>
    %196 = arith.addf %190, %195 : vector<8x128xf32>
    %c0_79 = arith.constant 0 : index
    %c0_80 = arith.constant 0 : index
    %c0_81 = arith.constant 0 : index
    %197 = vector.load %arg4[%c0_79, %c0_80, %c0_81] : memref<1x8x128xf32, #tpu.memory_space<vmem>>, vector<1x8x128xf32>
    %198 = vector.shape_cast %197 : vector<1x8x128xf32> to vector<8x128xf32>
    %199 = vector.shape_cast %196 : vector<8x128xf32> to vector<1x8x128xf32>
    tpu.vector_store %arg4[%c0_79, %c0_80, %c0_81], %199 {strides = array<i32>} : memref<1x8x128xf32, #tpu.memory_space<vmem>>, vector<1x8x128xf32>,
    return
  }
  func.func @transform_0(%arg0: i32, %arg1: i32) -> (i32, i32, i32, i32) {
    %c0_i32 = arith.constant 0 : i32
    %c0_i32_0 = arith.constant 0 : i32
    %c0_i32_1 = arith.constant 0 : i32
    return %c0_i32, %arg0, %arg1, %c0_i32_0 : i32, i32, i32, i32
  }
  func.func @transform_1(%arg0: i32, %arg1: i32) -> (i32, i32, i32, i32) {
    %c0_i32 = arith.constant 0 : i32
    %c0_i32_0 = arith.constant 0 : i32
    %c0_i32_1 = arith.constant 0 : i32
    return %arg0, %c0_i32, %arg1, %c0_i32_0 : i32, i32, i32, i32
  }
  func.func @transform_2(%arg0: i32, %arg1: i32) -> (i32, i32, i32) {
    %c0_i32 = arith.constant 0 : i32
    %c0_i32_0 = arith.constant 0 : i32
    %c0_i32_1 = arith.constant 0 : i32
    return %arg0, %c0_i32, %c0_i32_0 : i32, i32, i32
  }
}

</mosaic_0001>

<bundles_post_ra>
// kernel: tpu_custom_call.1
= control target key start
LH: loop header
LB: loop body
LE: loop exit
PB: predicated region body
PF: predicated region fallthrough
CT: control target
= control target key end

     0   :  { %7 = vsyncpa [#allocation4], 0  ;;  %s1252_s0 = inlined_call_operand.vmem [shape: f32[2,2,8,2], index: 0, kind: input, shape index: {}]   ;;  %s1253_s1 = inlined_call_operand.hbm [shape: f32[2,2,8,256], index: 1, kind: input, shape index: {}]   ;;  %s1254_s2 = inlined_call_operand.hbm [shape: f32[2,8,128], index: 2, kind: output, shape index: {}]  }
   0x1   :  { %9 = vsyncpa [#allocation4 + $0x1], 0 }
   0x2   :  { %10 = vsyncpa [#allocation5], 0 }
   0x3   :  { %12 = vsyncpa [#allocation5 + $0x1], 0  ;;  %s962_s9 = smov 0   ;;  %s964_s10 = smov 0  }
   0x4   :  { %s966_s11 = smov 0   ;;  %s968_s12 = smov 0  }
   0x5   :  { %s970_s13 = smov 0   ;;  %s972_s14 = smov 0  }
   0x6 LB: > { %s700_s15 = sadd.s32 4294967295, %s940_s14   ;;  %s701_s16 = sadd.s32 4294967294, %s940_s14   ;;  %s940_s14 = sphi %s972_s14, %s18_s14   ;;  %s936_s13 = sphi %s970_s13, %s1271_s13   ;;  %s932_s12 = sphi %s968_s12, %s1270_s12   ;;  %s928_s11 = sphi %s966_s11, %s1269_s11   ;;  %s924_s10 = sphi %s964_s10, %s1268_s10   ;;  %s920_s9 = sphi %s962_s9, %s1267_s9  }
   0x7   : > { %s30_s17 = sadd.s32 1, %s936_s13  ;;  %s39_s18 = sadd.s32 1, %s928_s11 }
   0x8   : > { %p32_p0 = scmp.ge.s32.totalorder %s30_s17, 2  ;;  %p46_p1 = scmp.ne.s32.totalorder %s928_s11, %s924_s10 }
   0x9   : > { %p47_p2 = scmp.eq.s32.totalorder %s940_s14, 0  ;;  %p80_p3 = scmp.ne.s32.totalorder %s924_s10, %s920_s9 }
   0xa   : > { %s1273_s17 = smov (%p32_p0, %s30_s17), 0  ;;  %p81_p5 = scmp.eq.s32.totalorder %s700_s15, 0 }
   0xb   : > { %p1003_p4 = por %p47_p2, %p46_p1  ;;  %s34_s20 = ssub.s32 %s936_s13, %s1273_s17 }
   0xc   : > { %p104_p6 = scmp.eq.s32.totalorder %s700_s15, 1  ;;  %p37_p7 = scmp.eq.s32.totalorder %s34_s20, 0 }
   0xd   : > { %p1009_p8 = por %p81_p5, %p80_p3  ;;  %p110_p10 = scmp.eq.s32.totalorder %s701_s16, 1 }
   0xe   : > { %p1013_p9 = por %p104_p6, %p46_p1  ;;  %p703_p12 = scmp.ge.s32.totalorder %s940_s14, 2 }
   0xf   : > { %s1018_s23 = scalar_select %p37_p7, %s928_s11, %s39_s18  }
  0x10   : > { %p1020_p11 = por %p110_p10, %p80_p3  ;;  %126 = sbr.rel (%p703_p12) target bundleno = 33 (0x21), region = 16 }
  0x15   : > { %129 = sbr.rel (!%p1003_p4) target bundleno = 27 (0x1b), region = 20  ;;  %s131_s25 = sand.u32 (%p1003_p4), 1, %s928_s11  }
  0x16   : > { %s705_s26 = sshll.u32 (%p1003_p4), %s936_s13, 3  ;;  %s704_s27 = sshll.u32 (%p1003_p4), %s131_s25, 4 }
  0x17   : > { %s136_s30 = scalar_lea.vmem (%p1003_p4), %s1252_s0, %s705_s26  ;;  %s133_s3 = scalar_lea.vmem (%p1003_p4), [#allocation2], %s704_s27 }
  0x18   : > { %v167_v0 = vld [vmem:[%s136_s30] sm:$0xff] (%p1003_p4)  ;;  %v169_v1 = vld [vmem:[%s136_s30 + $0x10] sm:$0xff] (%p1003_p4) }
  0x19   : > { %168 = vst [vmem:[%s133_s3] sm:$0xff] (%p1003_p4), %v167_v0 }
  0x1a   : > { %170 = vst [vmem:[%s133_s3 + $0x8] sm:$0xff] %v169_v1 }
  0x1b PF: > { %s177_s4 = sand.u32 1, %s928_s11   ;;  %s730_s5 = sshll.u32 %s936_s13, 5 }
  0x1c   : > { %s706_s6 = sshll.u32 %s177_s4, 5  ;;  %s188_s15 = scalar_lea.hbm %s1253_s1, %s730_s5 }
  0x1d   : > { %s189_s16 = sshll.u32 %s188_s15, 4  ;;  %s181_s18 = scalar_lea.vmem [#allocation3], %s706_s6  ;;  %s190_s16 = int_to_ptr.hbm [resolvable:$true] %s189_s16 }
  0x1e   : > { %s191_s20 = sshll.u32 %s181_s18, 4  ;;  %s178_s25 = scalar_lea.sflag [#allocation4], %s177_s4  ;;  %s192_s20 = int_to_ptr.vmem [resolvable:$true] %s191_s20 }
  0x1f   : > { %s942_s26 = smov 256   ;;  %s943_s27 = smov 16  }
  0x20   : > { %733 = dma.hbm_to_vmem [thread:$0]  (%p1003_p4), %s190_s16, 512, %s192_s20, %s178_s25, %s942_s26, %s942_s26, %s943_s27  }
  0x21 PF: > { %p709_p13 = scmp.ge.s32.totalorder %s940_s14, 1  ;;  %p199_p0 = scmp.lt.s32.totalorder %s940_s14, 3 }
  0x23   : > { %p200_p1 = pnand %p709_p13, %p199_p0 }
  0x24   : > { %s1044_s28 = sand.u32 (!%p200_p1), 1, %s924_s10  }
  0x25   : > { %203 = sbr.rel (%p200_p1) target bundleno = 427 (0x1ab), region = 62  ;;  %s710_s29 = sshll.u32 (!%p200_p1), %s1044_s28, 4 }
  0x26   : > { %s711_s30 = sshll.u32 (!%p200_p1), %s1044_s28, 5  ;;  %s208_s3 = scalar_lea.vmem (!%p200_p1), [#allocation2], %s710_s29 }
  0x27   : > { %s213_s4 = scalar_lea.sflag (!%p200_p1), [#allocation4], %s1044_s28  ;;  %s216_s19 = scalar_lea.vmem (!%p200_p1), [#allocation3], %s711_s30 }
  0x2a   : > { %911 = dma.done.wait (%p1009_p8), %s213_s4, 512  }
  0x2b   : > { %913 = vsyncadd (%p1009_p8), %s213_s4, 4294966784  ;;  %v944_v2 = vmov 0   ;;  %v716_v3 = vld [vmem:[%s208_s3 + $0x8] sm:$0xff]  ;;  %v301_v4 = vld [vmem:[%s208_s3] sm:$0xff]  ;;  %v945_v11 = vmov 1   ;;  %v946_v12 = vmov 0.0   ;;  %v252_v17 = vlaneseq }
  0x2c   : > { %797 = vset.pattern.permute.xlu1 %v944_v2  ;;  %795 = vset.pattern.permute.xlu0 %v944_v2  ;;  %v1053_v5 = vld [vmem:[%s216_s19] sm:$0xff]  ;;  %v1055_v6 = vld [vmem:[%s216_s19 + $0x8] sm:$0xff]  ;;  %v1059_v8 = vld [vmem:[%s216_s19 + $0x10] sm:$0xff]  ;;  %vm401_vm0 = vcmp.ne.f32.partialorder %v716_v3, -1.0  ;;  %vm349_vm1 = vcmp.ne.f32.partialorder %v301_v4, -1.0  ;;  %s712_s21 = sshll.u32 %s1044_s28, 3 }
  0x2d   : > { %800 = vset.pattern.permute.xlu2 %v944_v2  ;;  %356 = vperm.xlu1 %797, %v716_v3   ;;  %v263_v7 = vadd.f32 %v1055_v6, %v1053_v5  ;;  %v1061_v9 = vld [vmem:[%s216_s19 + $0x18] sm:$0xff]  ;;  %v717_v13 = vsel %vm401_vm0, 1.0, %v946_v12  ;;  %v715_v14 = vsel %vm349_vm1, 1.0, %v946_v12  ;;  %v253_v18 = vand.u32 127, %v252_v17  ;;  %s727_s5 = sshll.u32 %s932_s12, 3  ;;  %s241_s15 = scalar_lea.vmem [#allocation6], %s712_s21 }
  0x2e   : > { %304 = vperm.xlu0 %795, %v301_v4   ;;  %v266_v10 = vadd.f32 %v1061_v9, %v1059_v8  ;;  %v509_v15 = vmul.f32 0.2, %v717_v13  ;;  %v424_v16 = vmul.f32 0.2, %v715_v14  ;;  %s595_s8 = scalar_lea.hbm %s1254_s2, %s727_s5  ;;  %s597_s16 = sshll.u32 %s241_s15, 4  ;;  %s598_s16 = int_to_ptr.vmem [resolvable:$true] %s597_s16 }
  0x2f   : > { %264 = vadd.xlane.f32.xlu2 %v263_v7  ;;  %v254_v19 = vadd.s32 128, %v253_v18  ;;  %v255_v20 = vshra.s32 %v253_v18, 4  ;;  %v259_v25 = vand.u32 15, %v253_v18  ;;  %s599_s18 = sshll.u32 %s595_s8, 4  ;;  %s585_s25 = scalar_lea.sflag [#allocation5], %s1044_s28  ;;  %s600_s18 = int_to_ptr.hbm [resolvable:$true] %s599_s18 }
  0x30   : > { %s872_s26 = sshra.s32 %s600_s18, 4  ;;  %s878_s30 = scalar_lea.hbm %s1254_s2, 16  ;;  %s873_s26 = int_to_ptr.hbm [resolvable:$true] %s872_s26 }
  0x31   : > { %v256_v21 = vshra.s32 %v254_v19, 4  ;;  %v257_v24 = vcvt.s32.f32 %v255_v20  ;;  %v260_v26 = vand.u32 15, %v254_v19  ;;  %v261_v31 = vcvt.s32.f32 %v259_v25  ;;  %s874_s27 = scalar_lea.hbm %s873_s26, 8  ;;  %p879_p5 = scmp.lt.s32.totalorder %s873_s26, %s1254_s2 }
  0x32   : > { %p875_p2 = scmp.ne.s32.totalorder %s873_s26, %s874_s27  ;;  %p880_p6 = scmp.lt.s32.totalorder %s878_s30, %s874_s27 }
  0x33   : > { %v258_v27 = vcvt.s32.f32 %v256_v21  ;;  %v262_v32 = vcvt.s32.f32 %v260_v26 }
  0x34   : > { %p876_p3 = pnand %p875_p2, %p1013_p9  ;;  %p881_p7 = por %p880_p6, %p879_p5 }
  0x35   : > { %798 = vset.pattern.permute.xlu1 %v945_v11 }
  0x36   : > { %796 = vset.pattern.permute.xlu0 %v945_v11  ;;  %364 = vperm.xlu1 %798, %v716_v3   ;;  %p877_p4 = pneg %p876_p3 }
  0x37   : > { %312 = vperm.xlu0 %796, %v301_v4   ;;  %267 = vadd.xlane.f32.xlu2 %v266_v10 }
  0x38   : > { %p882_p8 = pnand %p881_p7, %p877_p4 }
  0x3e   : > { %799 = vset.pattern.permute.xlu1 %v944_v2 }
  0x3f   : > { %801 = vset.pattern.permute.xlu0 %v944_v2  ;;  %427 = vperm.xlu1 %799, %v424_v16  }
  0x40   : > { %512 = vperm.xlu0 %801, %v509_v15  }
  0x47   : > { %535 = vperm.xlu1 %799, %v717_v13  }
  0x4f   : > { %450 = vperm.xlu2 %800, %v715_v14  }
  0x9f   : > { %v357_v23 = vpop.permute.xlu1 %356 }
  0xa0   : > { %v305_v22 = vpop.permute.xlu0 %304  ;;  %v359_v29 = vsub.f32 %v257_v24, %v357_v23  ;;  %v360_v30 = vsub.f32 %v258_v27, %v357_v23 }
  0xa1   : > { %v307_v28 = vsub.f32 %v257_v24, %v305_v22  ;;  %v308_v33 = vsub.f32 %v258_v27, %v305_v22 }
  0xa2   : > { %v361_v35 = vadd.f32 1e-06, %v359_v29  ;;  %v362_v36 = vadd.f32 1e-06, %v360_v30  ;;  %v265_v54 = vpop.xlane.xlu2 %264 }
  0xa3   : > { %v309_v34 = vadd.f32 1e-06, %v307_v28  ;;  %v310_v43 = vadd.f32 1e-06, %v308_v33  ;;  %v1071_v61 = vadd.f32 1e-06, %v265_v54 }
  0xa4   : > { %v371_v48 = vmul.f32 %v361_v35, %v361_v35  ;;  %v372_v50 = vmul.f32 %v362_v36, %v362_v36 }
  0xa5   : > { %v319_v47 = vmul.f32 %v309_v34, %v309_v34  ;;  %v320_v55 = vmul.f32 %v310_v43, %v310_v43  ;;  %vm275_vm10 = vweird.f32 %v1071_v61 }
  0xa8   : > { %v365_v37 = vpop.permute.xlu1 %364 }
  0xa9   : > { %v313_v38 = vpop.permute.xlu0 %312  ;;  %v367_v39 = vsub.f32 %v261_v31, %v365_v37  ;;  %v368_v40 = vsub.f32 %v262_v32, %v365_v37 }
  0xaa   : > { %v315_v41 = vsub.f32 %v261_v31, %v313_v38  ;;  %v316_v42 = vsub.f32 %v262_v32, %v313_v38  ;;  %v268_v63 = vpop.xlane.xlu2 %267 }
  0xab   : > { %v369_v44 = vadd.f32 1e-06, %v367_v39  ;;  %v370_v45 = vadd.f32 1e-06, %v368_v40  ;;  %v1076_v7 = vadd.f32 1e-06, %v268_v63 }
  0xac   : > { %v317_v46 = vadd.f32 1e-06, %v315_v41  ;;  %v318_v49 = vadd.f32 1e-06, %v316_v42 }
  0xad   : > { %v373_v51 = vmul.f32 %v369_v44, %v369_v44  ;;  %v374_v52 = vmul.f32 %v370_v45, %v370_v45  ;;  %vm291_vm11 = vweird.f32 %v1076_v7 }
  0xae   : > { %v321_v53 = vmul.f32 %v317_v46, %v317_v46  ;;  %v322_v56 = vmul.f32 %v318_v49, %v318_v49 }
  0xaf   : > { %v375_v57 = vadd.f32 %v373_v51, %v371_v48  ;;  %v376_v58 = vadd.f32 %v374_v52, %v372_v50 }
  0xb0   : > { %v1067_v59 = vadd.f32 %v321_v53, %v319_v47  ;;  %v1069_v60 = vadd.f32 %v322_v56, %v320_v55 }
  0xb1   : > { %802 = vrsqrt.f32 %v375_v57  ;;  %vm384_vm6 = vcmp.eq.f32.partialorder %v375_v57, inf  ;;  %vm386_vm7 = vcmp.eq.f32.partialorder %v375_v57, 0.0  ;;  %v387_v33 = vand.u32 2147483648, %v375_v57 }
  0xb2   : > { %804 = vrsqrt.f32 %v376_v58  ;;  %vm332_vm2 = vcmp.eq.f32.partialorder %v1067_v59, inf  ;;  %vm334_vm3 = vcmp.eq.f32.partialorder %v1067_v59, 0.0  ;;  %v335_v27 = vand.u32 2147483648, %v1067_v59 }
  0xb3   : > { %806 = vrsqrt.f32 %v1067_v59  ;;  %vm344_vm4 = vcmp.eq.f32.partialorder %v1069_v60, inf  ;;  %vm346_vm5 = vcmp.eq.f32.partialorder %v1069_v60, 0.0  ;;  %vm396_vm8 = vcmp.eq.f32.partialorder %v376_v58, inf }
  0xb4   : > { %808 = vrsqrt.f32 %v1069_v60  ;;  %v399_v38 = vand.u32 2147483648, %v376_v58  ;;  %vm398_vm9 = vcmp.eq.f32.partialorder %v376_v58, 0.0  ;;  %v347_v43 = vand.u32 2147483648, %v1069_v60 }
  0xb5   : > { %810 = vrcp.f32 %v1071_v61 }
  0xb6   : > { %812 = vrcp.f32 %v1076_v7 }
  0xb7   : > { %v803_v62 = vpop.eup %802 }
  0xb8   : > { %v805_v0 = vpop.eup %804  ;;  %v378_v1 = vmul.f32 %v803_v62, %v375_v57 }
  0xb9   : > { %v807_v2 = vpop.eup %806  ;;  %v390_v3 = vmul.f32 %v805_v0, %v376_v58 }
  0xba   : > { %v809_v4 = vpop.eup %808  ;;  %v326_v10 = vmul.f32 %v807_v2, %v1067_v59  ;;  %v379_v11 = vmul.f32 %v803_v62, %v378_v1 }
  0xbb   : > { %v338_v13 = vmul.f32 %v809_v4, %v1069_v60  ;;  %v391_v14 = vmul.f32 %v805_v0, %v390_v3  ;;  %v1080_v15 = vpop.eup %810 }
  0xbc   : > { %v327_v16 = vmul.f32 %v807_v2, %v326_v10  ;;  %v380_v17 = vmul.f32 0.5, %v379_v11  ;;  %v271_v22 = vmul.f32 %v1080_v15, %v1071_v61  ;;  %v1090_v35 = vpop.eup %812  ;;  %vm276_vm12 = vweird.f32 %v1080_v15 }
  0xbd   : > { %v339_v18 = vmul.f32 %v809_v4, %v338_v13  ;;  %v392_v19 = vmul.f32 0.5, %v391_v14  ;;  %v287_v46 = vmul.f32 %v1090_v35, %v1076_v7  ;;  %vm292_vm13 = vweird.f32 %v1090_v35  ;;  %vm1138_vm0 = vmor %vm275_vm10, %vm276_vm12 }
  0xbe   : > { %v328_v20 = vmul.f32 0.5, %v327_v16  ;;  %v381_v21 = vsub.f32 1.5, %v380_v17  ;;  %v281_v17 = vand.u32 2147483648, %v1071_v61 }
  0xbf   : > { %v340_v23 = vmul.f32 0.5, %v339_v18  ;;  %v393_v24 = vsub.f32 1.5, %v392_v19  ;;  %v288_v1 = vsub.f32 1.0, %v287_v46 }
  0xc0   : > { %v329_v25 = vsub.f32 1.5, %v328_v20  ;;  %v382_v26 = vmul.f32 %v803_v62, %v381_v21  ;;  %v272_v62 = vsub.f32 1.0, %v271_v22  ;;  %v279_v21 = vand.u32 2147483647, %v1071_v61 }
  0xc1   : > { %v341_v28 = vsub.f32 1.5, %v340_v23  ;;  %v394_v29 = vmul.f32 %v805_v0, %v393_v24  ;;  %v289_v19 = vmul.f32 %v1090_v35, %v288_v1  ;;  %v297_v22 = vand.u32 2147483648, %v1076_v7 }
  0xc2   : > { %v330_v30 = vmul.f32 %v807_v2, %v329_v25  ;;  %v383_v31 = vmul.f32 %v382_v26, %v375_v57  ;;  %v273_v16 = vmul.f32 %v1080_v15, %v272_v62  ;;  %v295_v25 = vand.u32 2147483647, %v1076_v7 }
  0xc3   : > { %v342_v32 = vmul.f32 %v809_v4, %v341_v28  ;;  %v395_v34 = vmul.f32 %v394_v29, %v376_v58  ;;  %vm1142_vm1 = vcmp.eq.f32.partialorder %v279_v21, 8.507059e+37  ;;  %v282_v29 = vor.u32 1.1754944e-38, %v281_v17 }
  0xc4   : > { %v331_v36 = vmul.f32 %v330_v30, %v1067_v59  ;;  %v385_v37 = vsel %vm384_vm6, %v375_v57, %v383_v31  ;;  %v274_v24 = vadd.f32 %v1080_v15, %v273_v16  ;;  %v290_v30 = vadd.f32 %v1090_v35, %v289_v19 }
  0xc5   : > { %v343_v39 = vmul.f32 %v342_v32, %v1069_v60  ;;  %v1094_v40 = vsel %vm386_vm7, %v387_v33, %v385_v37  ;;  %v397_v41 = vsel %vm396_vm8, %v376_v58, %v395_v34  ;;  %v298_v61 = vor.u32 1.1754944e-38, %v297_v22  ;;  %v451_v32 = vpop.permute.xlu2 %450 }
  0xc6   : > { %v333_v42 = vsel %vm332_vm2, %v1067_v59, %v331_v36  ;;  %v1100_v44 = vsel %vm398_vm9, %v399_v38, %v397_v41  ;;  %v493_v45 = vmul.f32 0.4, %v1094_v40  ;;  %v501_v53 = vmul.f32 0.18181819, %v1094_v40  ;;  %v428_v36 = vpop.permute.xlu1 %427 }
  0xc7   : > { %v1107_v47 = vsel %vm334_vm3, %v335_v27, %v333_v42  ;;  %v345_v48 = vsel %vm344_vm4, %v1069_v60, %v343_v39  ;;  %v494_v49 = vmul.f32 0.4, %v1100_v44  ;;  %v502_v59 = vmul.f32 0.18181819, %v1100_v44  ;;  %vm1150_vm3 = vmor %vm291_vm11, %vm292_vm13 }
  0xc8   : > { %v1115_v50 = vsel %vm346_vm5, %v347_v43, %v345_v48  ;;  %v408_v51 = vmul.f32 0.33333334, %v1107_v47  ;;  %v416_v52 = vmul.f32 0.16666667, %v1107_v47  ;;  %v495_v58 = vsub.f32 1.0, %v493_v45 }
  0xc9   : > { %v409_v54 = vmul.f32 0.33333334, %v1115_v50  ;;  %v417_v55 = vmul.f32 0.16666667, %v1115_v50  ;;  %v496_v0 = vsub.f32 1.0, %v494_v49  ;;  %v503_v4 = vsub.f32 1.0, %v501_v53  ;;  %v513_v53 = vpop.permute.xlu0 %512 }
  0xca   : > { %v410_v56 = vsub.f32 1.0, %v408_v51  ;;  %v418_v57 = vsub.f32 1.0, %v416_v52  ;;  %v497_v13 = vmul.f32 1.442695, %v495_v58  ;;  %v504_v14 = vsub.f32 1.0, %v502_v59 }
  0xcb   : > { %v411_v63 = vsub.f32 1.0, %v409_v54  ;;  %v419_v60 = vsub.f32 1.0, %v417_v55  ;;  %v499_v18 = vmul.f32 1.442695, %v496_v0  ;;  %v505_v20 = vmul.f32 1.442695, %v503_v4 }
  0xcc   : > { %v412_v2 = vmul.f32 1.442695, %v410_v56  ;;  %v420_v3 = vmul.f32 1.442695, %v418_v57  ;;  %v507_v23 = vmul.f32 1.442695, %v504_v14  ;;  %v278_v7 = vsel %vm1138_vm0, %v1080_v15, %v274_v24 }
  0xcd   : > { %v414_v10 = vmul.f32 1.442695, %v411_v63  ;;  %v422_v11 = vmul.f32 1.442695, %v419_v60  ;;  %vm404_vm14 = vcmp.gt.f32.partialorder %v1094_v40, 5.5  ;;  %vm405_vm15 = vcmp.gt.f32.partialorder %v1100_v44, 5.5 }
  0xce   : > { %814 = vpow2.f32 %v412_v2  ;;  %vm489_vm2 = vcmp.gt.f32.partialorder %v1107_v47, 6.0  ;;  %v406_v33 = vsel %vm404_vm14, 1.0, %v946_v12  ;;  %vm490_vm4 = vcmp.gt.f32.partialorder %v1115_v50, 6.0 }
  0xcf   : > { %816 = vpow2.f32 %v414_v10  ;;  %v407_v38 = vsel %vm405_vm15, 1.0, %v946_v12  ;;  %vm1162_vm5 = vcmp.eq.f32.partialorder %v295_v25, 8.507059e+37  ;;  %v294_v46 = vsel %vm1150_vm3, %v1090_v35, %v290_v30 }
  0xd0   : > { %818 = vpow2.f32 %v420_v3  ;;  %v430_v49 = vmul.f32 %v428_v36, %v406_v33  ;;  %v491_v52 = vsel %vm489_vm2, 1.0, %v946_v12  ;;  %v492_v15 = vsel %vm490_vm4, 1.0, %v946_v12 }
  0xd1   : > { %820 = vpow2.f32 %v422_v11  ;;  %v431_v55 = vmul.f32 %v428_v36, %v407_v38  ;;  %v283_v35 = vsel %vm1142_vm1, %v282_v29, %v278_v7  ;;  %v1179_v47 = vsel %vm1162_vm5, %v298_v61, %v294_v46 }
  0xd2   : > { %822 = vpow2.f32 %v497_v13  ;;  %v515_v0 = vmul.f32 %v513_v53, %v491_v52  ;;  %v516_v50 = vmul.f32 %v513_v53, %v492_v15  ;;  %v475_v4 = vsub.f32 1.0, %v1053_v5 }
  0xd3   : > { %824 = vpow2.f32 %v499_v18  ;;  %v476_v14 = vsub.f32 1.0, %v1055_v6  ;;  %v483_v19 = vsub.f32 1.0, %v1059_v8 }
  0xd4   : > { %v815_v26 = vpop.eup %814  ;;  %826 = vpow2.f32 %v505_v20 }
  0xd5   : > { %v817_v31 = vpop.eup %816  ;;  %v432_v34 = vsub.f32 1.0, %v815_v26  ;;  %828 = vpow2.f32 %v507_v23  ;;  %v718_v3 = vadd.f32 -1.0, %v815_v26  ;;  %v484_v23 = vsub.f32 1.0, %v1061_v9 }
  0xd6   : > { %v819_v37 = vpop.eup %818  ;;  %v433_v39 = vsub.f32 1.0, %v817_v31  ;;  %v719_v13 = vadd.f32 -1.0, %v817_v31 }
  0xd7   : > { %v821_v40 = vpop.eup %820  ;;  %v434_v42 = vmax.f32 %v432_v34, 0.0  ;;  %v438_v43 = vsub.f32 1.0, %v819_v37  ;;  %v720_v21 = vadd.f32 -1.0, %v819_v37  ;;  %v446_v27 = vmax.f32 %v718_v3, 0.0 }
  0xd8   : > { %v823_v45 = vpop.eup %822  ;;  %v435_v48 = vmax.f32 %v433_v39, 0.0  ;;  %v439_v44 = vsub.f32 1.0, %v821_v40  ;;  %v721_v22 = vadd.f32 -1.0, %v821_v40  ;;  %v447_v31 = vmax.f32 %v719_v13, 0.0 }
  0xd9   : > { %v825_v51 = vpop.eup %824  ;;  %v440_v54 = vmax.f32 %v438_v43, 0.0  ;;  %v517_v57 = vsub.f32 1.0, %v823_v45  ;;  %v436_v59 = vmul.f32 %v434_v42, %v430_v49  ;;  %v722_v26 = vadd.f32 -1.0, %v823_v45 }
  0xda   : > { %v827_v56 = vpop.eup %826  ;;  %v441_v58 = vmax.f32 %v439_v44, 0.0  ;;  %v437_v62 = vmul.f32 %v435_v48, %v431_v55  ;;  %v518_v1 = vsub.f32 1.0, %v825_v51  ;;  %v723_v30 = vadd.f32 -1.0, %v825_v51 }
  0xdb   : > { %v442_v63 = vmul.f32 %v440_v54, %v430_v49  ;;  %v829_v60 = vpop.eup %828  ;;  %v523_v2 = vsub.f32 1.0, %v827_v56  ;;  %v519_v10 = vmax.f32 %v517_v57, 0.0  ;;  %v461_v11 = vmul.f32 %v436_v59, %v283_v35 }
  0xdc   : > { %v443_v12 = vmul.f32 %v441_v58, %v431_v55  ;;  %v524_v16 = vsub.f32 1.0, %v829_v60  ;;  %v462_v17 = vmul.f32 %v437_v62, %v283_v35  ;;  %v520_v24 = vmax.f32 %v518_v1, 0.0  ;;  %v536_v55 = vpop.permute.xlu1 %535 }
  0xdd   : > { %v467_v18 = vmul.f32 %v442_v63, %v1179_v47  ;;  %v525_v25 = vmax.f32 %v523_v2, 0.0  ;;  %v521_v28 = vmul.f32 %v519_v10, %v515_v0  ;;  %v463_v29 = vmul.f32 %v461_v11, %v1053_v5 }
  0xde   : > { %v468_v20 = vmul.f32 %v443_v12, %v1179_v47  ;;  %v526_v61 = vmax.f32 %v524_v16, 0.0  ;;  %v464_v33 = vmul.f32 %v462_v17, %v1055_v6  ;;  %v724_v36 = vadd.f32 -1.0, %v827_v56 }
  0xdf   : > { %v469_v34 = vmul.f32 %v1059_v8, %v467_v18  ;;  %v725_v38 = vadd.f32 -1.0, %v829_v60  ;;  %v457_v39 = vmax.f32 %v720_v21, 0.0  ;;  %v458_v40 = vmax.f32 %v721_v22, 0.0 }
  0xe0   : > { %v470_v37 = vmul.f32 %v1061_v9, %v468_v20  ;;  %v522_v7 = vmul.f32 %v520_v24, %v516_v50  ;;  %v527_v41 = vmul.f32 %v525_v25, %v515_v0  ;;  %v531_v42 = vmax.f32 %v722_v26, 0.0 }
  0xe1   : > { %v453_v43 = vmul.f32 %v451_v32, %v446_v27  ;;  %v532_v45 = vmax.f32 %v723_v30, 0.0  ;;  %v454_v46 = vmul.f32 %v451_v32, %v447_v31  ;;  %v459_v48 = vmul.f32 %v457_v39, %v451_v32 }
  0xe2   : > { %v460_v44 = vmul.f32 %v458_v40, %v451_v32  ;;  %v528_v49 = vmul.f32 %v526_v61, %v516_v50  ;;  %v471_v51 = vadd.f32 %v469_v34, %v463_v29  ;;  %v542_v52 = vmax.f32 %v724_v36, 0.0 }
  0xe3   : > { %v473_v15 = vmul.f32 0.035367765, %v453_v43  ;;  %v472_v53 = vadd.f32 %v470_v37, %v464_v33  ;;  %v543_v54 = vmax.f32 %v725_v38, 0.0  ;;  %v474_v56 = vmul.f32 0.035367765, %v454_v46 }
  0xe4   : > { %v481_v57 = vmul.f32 0.008841941, %v459_v48  ;;  %v546_v58 = vmul.f32 %v521_v28, %v283_v35  ;;  %v538_v59 = vmul.f32 %v536_v55, %v531_v42  ;;  %v482_v63 = vmul.f32 0.008841941, %v460_v44 }
  0xe5   : > { %v477_v62 = vmul.f32 %v475_v4, %v473_v15  ;;  %v547_v60 = vmul.f32 %v522_v7, %v283_v35  ;;  %v539_v0 = vmul.f32 %v536_v55, %v532_v45  ;;  %v478_v12 = vmul.f32 %v476_v14, %v474_v56 }
  0xe6   : > { %v552_v50 = vmul.f32 %v527_v41, %v1179_v47  ;;  %v544_v1 = vmul.f32 %v542_v52, %v536_v55  ;;  %v485_v3 = vmul.f32 %v483_v19, %v481_v57  ;;  %v553_v10 = vmul.f32 %v528_v49, %v1179_v47 }
  0xe7   : > { %v479_v2 = vadd.f32 %v477_v62, %v471_v51  ;;  %v545_v11 = vmul.f32 %v543_v54, %v536_v55  ;;  %v480_v13 = vadd.f32 %v478_v12, %v472_v53  ;;  %v486_v16 = vmul.f32 %v484_v23, %v482_v63 }
  0xe8   : > { %v548_v35 = vmul.f32 %v546_v58, %v1053_v5  ;;  %v558_v17 = vmul.f32 0.050929584, %v538_v59  ;;  %v549_v20 = vmul.f32 %v547_v60, %v1055_v6  ;;  %v559_v21 = vmul.f32 0.050929584, %v539_v0 }
  0xe9   : > { %v487_v18 = vadd.f32 %v485_v3, %v479_v2  ;;  %v488_v22 = vadd.f32 %v486_v16, %v480_v13  ;;  %v554_v24 = vmul.f32 %v1059_v8, %v552_v50  ;;  %v564_v25 = vmul.f32 0.010522641, %v544_v1 }
  0xea   : > { %v555_v27 = vmul.f32 %v1061_v9, %v553_v10  ;;  %v565_v47 = vmul.f32 0.010522641, %v545_v11  ;;  %v560_v30 = vmul.f32 %v558_v17, %v475_v4  ;;  %v561_v32 = vmul.f32 %v559_v21, %v476_v14 }
  0xeb   : > { %v550_v26 = vadd.f32 %v548_v35, %v487_v18  ;;  %v551_v28 = vadd.f32 %v549_v20, %v488_v22  ;;  %v566_v33 = vmul.f32 %v564_v25, %v483_v19 }
  0xec   : > { %v567_v36 = vmul.f32 %v565_v47, %v484_v23 }
  0xed   : > { %v556_v29 = vadd.f32 %v554_v24, %v550_v26  ;;  %v557_v31 = vadd.f32 %v555_v27, %v551_v28 }
  0xef   : > { %v562_v61 = vadd.f32 %v560_v30, %v556_v29  ;;  %v563_v34 = vadd.f32 %v561_v32, %v557_v31 }
  0xf1   : > { %v568_v37 = vadd.f32 %v566_v33, %v562_v61  ;;  %v569_v38 = vadd.f32 %v567_v36, %v563_v34 }
  0xf3   : > { %v571_v39 = vadd.f32 %v569_v38, %v568_v37 }
  0xf5   : > { %572 = vadd.xlane.f32.xlu1 %v571_v39 }
 0x168   : > { %v573_v5 = vpop.xlane.xlu1 %572 }
 0x169   : > { %v574_v4 = vrot.slane %v573_v5, 4 }
 0x16b   : > { %v575_v40 = vadd.f32 %v574_v4, %v573_v5 }
 0x16d   : > { %v576_v7 = vrot.slane %v575_v40, 2 }
 0x16f   : > { %v577_v6 = vadd.f32 %v576_v7, %v575_v40 }
 0x171   : > { %v578_v14 = vrot.slane %v577_v6, 1 }
 0x173   : > { %v579_v41 = vadd.f32 %v578_v14, %v577_v6 }
 0x175   : > { %731 = vpush %v579_v41 }
 0x1a6   : > { %s732_s20 = spop %731 }
 0x1a7   : > { %v581_v8 = vstv %s732_s20 }
 0x1a8   : > { %583 = vst [vmem:[%s241_s15] sm:$0xff] %v581_v8 }
 0x1a9   : > { %885 = shalt.err (!%p882_p8)
}
 0x1aa   : > { %735 = dma.vmem_to_hbm [thread:$0]  (%p1013_p9), %s598_s16, 128, %s600_s18, %s585_s25  }
 0x1ab PF: > { %s611_s28 = sand.u32 1, %s920_s9   ;;  %p738_p10 = pnand %p703_p12, %p1020_p11 }
 0x1ac   : > { %s612_s19 = scalar_lea.sflag [#allocation5], %s611_s28 }
 0x1ad   : > { %p739_p13 = pneg %p738_p10 }
 0x1af   : > { %915 = dma.done.wait (%p739_p13), %s612_s19, 128  }
 0x1b0   : > { %917 = vsyncadd (%p739_p13), %s612_s19, 4294967168  ;;  %s18_s14 = sadd.s32 1, %s940_s14   ;;  %s1267_s9 = smov %s924_s10 }
 0x1b1   : > { %p15_p0 = scmp.ge.s32.totalorder %s18_s14, 4   ;;  %s1268_s10 = smov %s928_s11 }
 0x1b2   : > { %s1269_s11 = smov %s1018_s23  ;;  %s1270_s12 = smov %s936_s13 }
 0x1b3   : > { %s1271_s13 = smov %s1273_s17  ;;  %17 = sbr.rel (!%p15_p0) target bundleno = 6 (0x6), region = 125 }
 0x1b8   :  { %618 = vsyncpa [#allocation4], 1 }
 0x1b9   :  { %620 = vsyncpa [#allocation4 + $0x1], 1 }
 0x1ba   :  { %621 = vsyncpa [#allocation5], 1 }
 0x1bb   :  { %623 = vsyncpa [#allocation5 + $0x1], 1 }

</bundles_post_ra>
